<compile_context>
chip_gen: v7x
topology: tpu7x:2x2x1
jax: 0.10.0
libtpu: 0.0.40
codegen_flags: <defaults>
</compile_context>

<pallas_src>
import jax
import jax.numpy as jnp
from jax.experimental import pallas as pl
from jax.experimental.pallas import tpu as pltpu


def _ff_kernel(x_ref, w1_ref, b1_ref, w2_ref, b2_ref, o_ref, acc_ref):
    # x_ref:  (tm, dim)       VMEM (block index constant in k -> one DMA per row tile)
    # w1_ref: (dim, tk)       VMEM
    # b1_ref: (1, tk)         VMEM
    # w2_ref: (tk, dim_out)   VMEM
    # b2_ref: (1, dim_out)    VMEM (constant index -> DMA'd once)
    # o_ref:  (tm, dim_out)   VMEM (resident across the k axis)
    # acc_ref:(tm, dim_out)   VMEM f32 scratch accumulator
    k = pl.program_id(1)

    @pl.when(k == 0)
    def _():
        # Seed the accumulator with b2 so the finalize step is just a cast (keeps the
        # bias add off the critical epilogue path in front of the output DMA).
        acc_ref[...] = jnp.broadcast_to(
            b2_ref[...].astype(jnp.float32), acc_ref.shape)

    # First Linear over this slice of `inner`: native-dtype operands on the MXU,
    # f32 accumulation via preferred_element_type.
    h = jnp.dot(x_ref[...], w1_ref[...], preferred_element_type=jnp.float32)
    h = h + b1_ref[...].astype(jnp.float32)

    # Exact (erf) GELU, matching torch.nn.GELU() default. Elementwise over `inner`,
    # so K-tiling is exact. Kept in f32 (v5e VPU/EUP lack a bf16 path).
    h = 0.5 * h * (1.0 + jax.lax.erf(h * jnp.float32(0.7071067811865476)))

    # Dropout(p=0.0) is identity — nothing to do.
    # TODO(synk): nonzero training dropout would need pltpu.prng_seed + prng_random_bits.

    # Second Linear: cast the intermediate to the weight dtype (bf16 fast path halves
    # vreg footprint and doubles MXU rate); accumulate in f32.
    acc_ref[...] += jnp.dot(h.astype(w2_ref.dtype), w2_ref[...],
                            preferred_element_type=jnp.float32)

    @pl.when(k == pl.num_programs(1) - 1)
    def _():
        o_ref[...] = acc_ref[...].astype(o_ref.dtype)


def _vmem_limit_and_budget():
    """Returns (scoped vmem_limit_bytes for Mosaic, byte budget for our own tiles)."""
    cap = None
    try:
        info = pltpu.get_tpu_info()
        cap = int(getattr(info, "vmem_capacity_bytes", 0)) or None
    except Exception:
        cap = None
    if cap is None:
        cap = 64 * 1024 * 1024  # conservative fallback: v7x per-TensorCore capacity
    # Leave headroom for Mosaic internal scratch, semaphores and pipeline slack:
    # v7x (64 MiB) -> 48 MiB limit; v5e/v6e (128 MiB) -> 112 MiB limit.
    limit = min(cap, max(cap - 16 * 1024 * 1024, 32 * 1024 * 1024))
    budget = int(limit * 0.85)
    return int(limit), budget


def _tile_bytes(tm, tk, dim, dim_out, x_it, w_it, out_it):
    """Conservative VMEM footprint of one pipelined grid step (double-buffered I/O)."""
    b = 0
    b += 2 * tm * dim * x_it          # x tile
    b += 2 * dim * tk * w_it          # W1 tile
    b += 2 * tk * w_it                # b1 tile
    b += 2 * tk * dim_out * w_it      # W2 tile
    b += 2 * dim_out * w_it           # b2 tile
    b += 2 * tm * dim_out * out_it    # out tile
    b += tm * dim_out * 4             # f32 accumulator scratch
    b += tm * tk * 4                  # f32 GELU intermediate
    b += tm * tk * w_it               # intermediate cast to the weight dtype
    return b


def _pick_tiles(M, dim, inner, dim_out, x_it, w_it, out_it, budget):
    def fits(tm, tk):
        return _tile_bytes(tm, tk, dim, dim_out, x_it, w_it, out_it) <= budget

    def round_up(a, b):
        return -(-a // b) * b

    # Row-tile candidates: multiples of 8 (sublane) except the full-M block, largest
    # first. Cap so the "parallel" axis has >= 2 blocks once M is large enough to split
    # across v7x's two TensorCores.
    tm_cap = M if M <= 256 else max(256, round_up(-(-M // 2), 8))
    cands = {tm_cap}
    for c in (4096, 2048, 1024, 512, 256, 128, 64, 32, 16, 8):
        if c <= tm_cap:
            cands.add(c)
    if M < 8:
        cands.add(M)
    tm_cands = sorted(cands, reverse=True)

    # Inner-tile candidates: must divide `inner` exactly (unmasked reduction) and be
    # lane-aligned. Prefer multiples of 256 (v6e/v7x MXU is 2x256^2); 128 last resort.
    tk_cands = [inner]
    for c in (16384, 8192, 4096, 2048, 1024, 512, 256, 128):
        if c < inner and inner % c == 0:
            tk_cands.append(c)

    # 1) Full weight residency: tk = inner -> constant weight block index -> W1/W2 are
    #    DMA'd from HBM exactly once for the whole kernel.
    for tm in tm_cands:
        if fits(tm, inner):
            return tm, inner

    # 2) Weights don't fit: maximize tm first (re-streamed weight bytes ~ M/tm), then
    #    pick the largest tk that fits.
    for tm in tm_cands:
        for tk in tk_cands:
            if fits(tm, tk):
                return tm, tk

    # 3) Last resort: smallest candidates; Mosaic will report if it still overflows.
    # TODO(synk): for dim >~ 8192 add a reduction tiling over `dim` for the first matmul
    # (nested pltpu.emit_pipeline / third "arbitrary" grid axis) instead of shrinking
    # tm/tk further.
    return tm_cands[-1], tk_cands[-1]


def feed_forward(x, w1, b1, w2, b2, *, compute_dtype=None):
    """FeedForward forward pass: x @ W1 + b1 -> GELU -> Dropout(p=0) -> @ W2 + b2.

    x: (B, N, dim). w1: (dim, inner), b1: (inner,), w2: (inner, dim_out), b2: (dim_out,).
    Weights are stored (in, out), i.e. transposed nn.Linear weights.

    compute_dtype: optional MXU operand dtype (e.g. jnp.bfloat16). When set, x/W1/W2 are
    cast before the kernel (f32 accumulation kept); this roughly doubles MXU rate and
    halves weight HBM traffic at the cost of operand rounding. Default None keeps the
    caller's dtypes untouched.
    """
    B, N, dim = x.shape
    inner = w1.shape[1]
    dim_out = w2.shape[1]
    M = B * N
    out_dtype = x.dtype

    if compute_dtype is not None:
        x = x.astype(compute_dtype)
        w1 = w1.astype(compute_dtype)
        w2 = w2.astype(compute_dtype)

    x2d = x.reshape(M, dim)

    x_it = jnp.dtype(x.dtype).itemsize
    w_it = jnp.dtype(w1.dtype).itemsize
    out_it = jnp.dtype(out_dtype).itemsize

    vmem_limit, budget = _vmem_limit_and_budget()
    tm, tk = _pick_tiles(M, dim, inner, dim_out, x_it, w_it, out_it, budget)

    grid_m = pl.cdiv(M, tm)
    grid_k = pl.cdiv(inner, tk)
    grid = (grid_m, grid_k)

    # Weight traffic: a single HBM pass when resident (tk == inner -> constant block
    # index), otherwise re-streamed once per row tile.
    weight_passes = 1 if tk == inner else grid_m
    weight_bytes = (dim * inner + inner * dim_out + inner + dim_out) * w_it
    cost = pl.CostEstimate(
        flops=2 * M * (dim * inner + inner * dim_out),
        transcendentals=M * inner,
        bytes_accessed=(M * dim) * x_it + (M * dim_out) * out_it
        + weight_passes * weight_bytes,
    )

    out2d = pl.pallas_call(
        _ff_kernel,
        out_shape=jax.ShapeDtypeStruct((M, dim_out), out_dtype),
        grid_spec=pltpu.PrefetchScalarGridSpec(
            num_scalar_prefetch=0,
            grid=grid,
            in_specs=[
                # x: block index constant along k -> DMA'd once per row tile.
                pl.BlockSpec((tm, dim), lambda i, k: (i, 0)),
                # W1/b1/W2: when tk == inner these maps are constant across the whole
                # grid -> fetched from HBM exactly once.
                pl.BlockSpec((dim, tk), lambda i, k: (0, k)),
                pl.BlockSpec((1, tk), lambda i, k: (0, k)),
                pl.BlockSpec((tk, dim_out), lambda i, k: (k, 0)),
                pl.BlockSpec((1, dim_out), lambda i, k: (0, 0)),
            ],
            # Output block index constant in k -> resident accumulator target.
            out_specs=pl.BlockSpec((tm, dim_out), lambda i, k: (i, 0)),
            scratch_shapes=[pltpu.VMEM((tm, dim_out), jnp.float32)],
        ),
        compiler_params=pltpu.CompilerParams(
            dimension_semantics=("parallel", "arbitrary"),
            vmem_limit_bytes=vmem_limit,
        ),
        cost_estimate=cost,
    )(x2d, w1, b1.reshape(1, inner), w2, b2.reshape(1, dim_out))

    return out2d.reshape(B, N, dim_out)


def feed_forward_ref(x, w1, b1, w2, b2):
    """Pure-JAX reference matching torch: Linear -> GELU(exact) -> Dropout(p=0) -> Linear."""
    h = jnp.einsum("bnd,di->bni", x, w1) + b1
    h = 0.5 * h * (1.0 + jax.lax.erf(h / jnp.sqrt(2.0)))
    return jnp.einsum("bni,io->bno", h, w2) + b2


if __name__ == "__main__":
    # FeedForward(dim=32, mult=4, glu=False, dropout=0.0) -> inner_dim=128, dim_out=32
    B, N, dim = 2, 8, 32
    mult = 4
    inner = dim * mult
    dim_out = dim

    key = jax.random.PRNGKey(0)
    kx, k1, k2, k3, k4 = jax.random.split(key, 5)

    x = jax.random.normal(kx, (B, N, dim), dtype=jnp.float32)
    # Deterministic synthetic parameters; shapes follow nn.Linear(dim, inner) and
    # nn.Linear(inner, dim_out), stored transposed as (in, out).
    w1 = jax.random.normal(k1, (dim, inner), dtype=jnp.float32) * (1.0 / jnp.sqrt(dim))
    b1 = jax.random.normal(k2, (inner,), dtype=jnp.float32) * 0.02
    w2 = jax.random.normal(k3, (inner, dim_out), dtype=jnp.float32) * (1.0 / jnp.sqrt(inner))
    b2 = jax.random.normal(k4, (dim_out,), dtype=jnp.float32) * 0.02

    out = feed_forward(x, w1, b1, w2, b2)
    jax.block_until_ready(out)

    ref = feed_forward_ref(x, w1, b1, w2, b2)
    assert out.shape == (B, N, dim_out), out.shape
    assert jnp.allclose(out, ref, atol=1e-5, rtol=1e-5), float(jnp.max(jnp.abs(out - ref)))

    print("KERNEL_OK")
</pallas_src>

<mosaic_0001>
module attributes {stable_mosaic.version = 11 : i64} {
  func.func @_ff_kernel(%arg0: i32, %arg1: i32, %arg2: memref<16x32xf32, #tpu.memory_space<vmem>>, %arg3: memref<32x128xf32, #tpu.memory_space<vmem>>, %arg4: memref<1x128xf32, #tpu.memory_space<vmem>>, %arg5: memref<128x32xf32, #tpu.memory_space<vmem>>, %arg6: memref<1x32xf32, #tpu.memory_space<vmem>>, %arg7: memref<16x32xf32, #tpu.memory_space<vmem>>, %arg8: memref<16x32xf32, #tpu.memory_space<vmem>>) attributes {dimension_semantics = [#tpu.dimension_semantics<parallel>, #tpu.dimension_semantics<arbitrary>], iteration_bounds = array<i64: 1, 1>, scalar_prefetch = 0 : i64, scratch_operands = 1 : i64, tpu.core_type = #tpu.core_type<tc>, window_params = [{transform_indices = @transform_0, window_bounds = array<i64: 16, 32>}, {transform_indices = @transform_1, window_bounds = array<i64: 32, 128>}, {transform_indices = @transform_2, window_bounds = array<i64: 1, 128>}, {transform_indices = @transform_3, window_bounds = array<i64: 128, 32>}, {pipeline_mode = #tpu.pipeline_mode<synchronous>, transform_indices = @transform_4, window_bounds = array<i64: 1, 32>}, {transform_indices = @transform_5, window_bounds = array<i64: 16, 32>}]} {
    %c0_i32 = arith.constant 0 : i32
    %0 = arith.cmpi eq, %arg1, %c0_i32 : i32
    %1 = arith.extui %0 : i1 to i32
    %c0_i32_0 = arith.constant 0 : i32
    %2 = arith.cmpi ne, %1, %c0_i32_0 : i32
    scf.if %2 {
      %c0_18 = arith.constant 0 : index
      %c0_19 = arith.constant 0 : index
      %25 = vector.load %arg6[%c0_18, %c0_19] : memref<1x32xf32, #tpu.memory_space<vmem>>, vector<1x32xf32>
      %26 = vector.shape_cast %25 : vector<1x32xf32> to vector<1x32xf32>
      %27 = vector.broadcast %26 : vector<1x32xf32> to vector<16x32xf32>
      %c0_20 = arith.constant 0 : index
      %c0_21 = arith.constant 0 : index
      %28 = vector.load %arg8[%c0_20, %c0_21] : memref<16x32xf32, #tpu.memory_space<vmem>>, vector<16x32xf32>
      tpu.vector_store %arg8[%c0_20, %c0_21], %27 {strides = array<i32>} : memref<16x32xf32, #tpu.memory_space<vmem>>, vector<16x32xf32>,
    } else {
    }
    %c0 = arith.constant 0 : index
    %c0_1 = arith.constant 0 : index
    %3 = vector.load %arg2[%c0, %c0_1] : memref<16x32xf32, #tpu.memory_space<vmem>>, vector<16x32xf32>
    %c0_2 = arith.constant 0 : index
    %c0_3 = arith.constant 0 : index
    %4 = vector.load %arg3[%c0_2, %c0_3] : memref<32x128xf32, #tpu.memory_space<vmem>>, vector<32x128xf32>
    %cst = arith.constant dense<0.000000e+00> : vector<16x128xf32>
    %5 = tpu.matmul %3, %4, %cst {dimension_numbers = #tpu.dot_dimension_numbers<[1], [0], [0], [1], [0, 0, 1, 1], [], []>} : vector<16x32xf32>, vector<32x128xf32>, vector<16x128xf32> -> vector<16x128xf32>
    %c0_4 = arith.constant 0 : index
    %c0_5 = arith.constant 0 : index
    %6 = vector.load %arg4[%c0_4, %c0_5] : memref<1x128xf32, #tpu.memory_space<vmem>>, vector<1x128xf32>
    %7 = vector.broadcast %6 : vector<1x128xf32> to vector<16x128xf32>
    %8 = arith.addf %5, %7 : vector<16x128xf32>
    %cst_6 = arith.constant 5.000000e-01 : f32
    %9 = vector.broadcast %cst_6 : f32 to vector<16x128xf32>
    %10 = arith.mulf %9, %8 : vector<16x128xf32>
    %cst_7 = arith.constant 0.707106769 : f32
    %11 = vector.broadcast %cst_7 : f32 to vector<16x128xf32>
    %12 = arith.mulf %8, %11 : vector<16x128xf32>
    %13 = math.erf %12 : vector<16x128xf32>
    %cst_8 = arith.constant 1.000000e+00 : f32
    %14 = vector.broadcast %cst_8 : f32 to vector<16x128xf32>
    %15 = arith.addf %14, %13 : vector<16x128xf32>
    %16 = arith.mulf %10, %15 : vector<16x128xf32>
    %c0_9 = arith.constant 0 : index
    %c0_10 = arith.constant 0 : index
    %17 = vector.load %arg8[%c0_9, %c0_10] : memref<16x32xf32, #tpu.memory_space<vmem>>, vector<16x32xf32>
    %c0_11 = arith.constant 0 : index
    %c0_12 = arith.constant 0 : index
    %18 = vector.load %arg5[%c0_11, %c0_12] : memref<128x32xf32, #tpu.memory_space<vmem>>, vector<128x32xf32>
    %cst_13 = arith.constant dense<0.000000e+00> : vector<16x32xf32>
    %19 = tpu.matmul %16, %18, %cst_13 {dimension_numbers = #tpu.dot_dimension_numbers<[1], [0], [0], [1], [0, 0, 1, 1], [], []>} : vector<16x128xf32>, vector<128x32xf32>, vector<16x32xf32> -> vector<16x32xf32>
    %20 = arith.addf %17, %19 : vector<16x32xf32>
    %c0_14 = arith.constant 0 : index
    %c0_15 = arith.constant 0 : index
    %21 = vector.load %arg8[%c0_14, %c0_15] : memref<16x32xf32, #tpu.memory_space<vmem>>, vector<16x32xf32>
    tpu.vector_store %arg8[%c0_14, %c0_15], %20 {strides = array<i32>} : memref<16x32xf32, #tpu.memory_space<vmem>>, vector<16x32xf32>,
    %c0_i32_16 = arith.constant 0 : i32
    %22 = arith.cmpi eq, %arg1, %c0_i32_16 : i32
    %23 = arith.extui %22 : i1 to i32
    %c0_i32_17 = arith.constant 0 : i32
    %24 = arith.cmpi ne, %23, %c0_i32_17 : i32
    scf.if %24 {
      %c0_18 = arith.constant 0 : index
      %c0_19 = arith.constant 0 : index
      %25 = vector.load %arg8[%c0_18, %c0_19] : memref<16x32xf32, #tpu.memory_space<vmem>>, vector<16x32xf32>
      %c0_20 = arith.constant 0 : index
      %c0_21 = arith.constant 0 : index
      %26 = vector.load %arg7[%c0_20, %c0_21] : memref<16x32xf32, #tpu.memory_space<vmem>>, vector<16x32xf32>
      tpu.vector_store %arg7[%c0_20, %c0_21], %25 {strides = array<i32>} : memref<16x32xf32, #tpu.memory_space<vmem>>, vector<16x32xf32>,
    } else {
    }
    return
  }
  func.func @transform_0(%arg0: i32, %arg1: i32) -> (i32, i32) {
    %c0_i32 = arith.constant 0 : i32
    %c0_i32_0 = arith.constant 0 : i32
    return %arg0, %c0_i32 : i32, i32
  }
  func.func @transform_1(%arg0: i32, %arg1: i32) -> (i32, i32) {
    %c0_i32 = arith.constant 0 : i32
    %c0_i32_0 = arith.constant 0 : i32
    return %c0_i32, %arg1 : i32, i32
  }
  func.func @transform_2(%arg0: i32, %arg1: i32) -> (i32, i32) {
    %c0_i32 = arith.constant 0 : i32
    %c0_i32_0 = arith.constant 0 : i32
    return %c0_i32, %arg1 : i32, i32
  }
  func.func @transform_3(%arg0: i32, %arg1: i32) -> (i32, i32) {
    %c0_i32 = arith.constant 0 : i32
    %c0_i32_0 = arith.constant 0 : i32
    return %arg1, %c0_i32 : i32, i32
  }
  func.func @transform_4(%arg0: i32, %arg1: i32) -> (i32, i32) {
    %c0_i32 = arith.constant 0 : i32
    %c0_i32_0 = arith.constant 0 : i32
    %c0_i32_1 = arith.constant 0 : i32
    return %c0_i32, %c0_i32_0 : i32, i32
  }
  func.func @transform_5(%arg0: i32, %arg1: i32) -> (i32, i32) {
    %c0_i32 = arith.constant 0 : i32
    %c0_i32_0 = arith.constant 0 : i32
    return %arg0, %c0_i32 : i32, i32
  }
}

</mosaic_0001>

<bundles_post_ra>
// kernel: tpu_custom_call.1
= control target key start
LH: loop header
LB: loop body
LE: loop exit
PB: predicated region body
PF: predicated region fallthrough
CT: control target
= control target key end

     0   :  { %vm32_vm0 = vcmask 261120   ;;  %s530_s0 = inlined_call_operand.vmem [shape: f32[16,32], index: 0, kind: input, shape index: {}]   ;;  %s531_s1 = inlined_call_operand.vmem [shape: f32[32,128], index: 1, kind: input, shape index: {}]   ;;  %s532_s2 = inlined_call_operand.vmem [shape: f32[1,128], index: 2, kind: input, shape index: {}]   ;;  %s533_s3 = inlined_call_operand.vmem [shape: f32[128,32], index: 3, kind: input, shape index: {}]   ;;  %s534_s4 = inlined_call_operand.vmem [shape: f32[1,32], index: 4, kind: input, shape index: {}]   ;;  %s535_s5 = inlined_call_operand.hbm [shape: f32[16,32], index: 5, kind: output, shape index: {}]  }
   0x1   :  { %v37_v0 = vld [vmem:[%s531_s1] sm:$0xff]  ;;  %v38_v1 = vld [vmem:[%s531_s1 + $0x8] sm:$0xff]  ;;  %v39_v2 = vld [vmem:[%s531_s1 + $0x10] sm:$0xff] }
   0x2   :  { %v334_v3 = vpack.c.bf16 %v38_v1, %v37_v0  ;;  %v40_v4 = vld [vmem:[%s531_s1 + $0x18] sm:$0xff]  ;;  %v35_v5 = vld [vmem:[%s530_s0] sm:$0xff]  ;;  %v143_v8 = vld [vmem:[%s533_s3 + $0x8] sm:$0xff] }
   0x3   :  { %v338_v6 = vpack.c.bf16 %v40_v4, %v39_v2  ;;  %296 = vmatprep.mubr.msk.f32.mxu0 %vm32_vm0, %v35_v5  ;;  %v142_v7 = vld [vmem:[%s533_s3] sm:$0xff]  ;;  %v144_v9 = vld [vmem:[%s533_s3 + $0x10] sm:$0xff]  ;;  %v145_v11 = vld [vmem:[%s533_s3 + $0x18] sm:$0xff] }
   0x4   :  { %335 = vmatprep.subr.bf16.mxu0 %v334_v3  ;;  %v342_v10 = vpack.c.bf16 %v143_v8, %v142_v7  ;;  %v346_v12 = vpack.c.bf16 %v145_v11, %v144_v9  ;;  %v146_v13 = vld [vmem:[%s533_s3 + $0x20] sm:$0xff]  ;;  %v147_v14 = vld [vmem:[%s533_s3 + $0x28] sm:$0xff] }
   0x5   :  { %337 = vmatpush3.bf16.msra.mxu0 %v334_v3 }
   0x6   :  { %10 = vsyncpa [#allocation4], 0  ;;  %339 = vmatprep.subr.bf16.mxu0 %v338_v6  ;;  %343 = vmatprep.subr.bf16.mxu1 %v342_v10  ;;  %v350_v15 = vpack.c.bf16 %v147_v14, %v146_v13  ;;  %v36_v16 = vld [vmem:[%s530_s0 + $0x8] sm:$0xff]  ;;  %v148_v17 = vld [vmem:[%s533_s3 + $0x30] sm:$0xff] }
   0x7   :  { %345 = vmatpush3.bf16.msra.mxu1 %v342_v10  ;;  %v149_v18 = vld [vmem:[%s533_s3 + $0x38] sm:$0xff]  ;;  %v150_v20 = vld [vmem:[%s533_s3 + $0x40] sm:$0xff]  ;;  %v151_v21 = vld [vmem:[%s533_s3 + $0x48] sm:$0xff] }
   0x8   :  { %347 = vmatprep.subr.bf16.mxu1 %v346_v12  ;;  %v354_v19 = vpack.c.bf16 %v149_v18, %v148_v17  ;;  %v358_v22 = vpack.c.bf16 %v151_v21, %v150_v20  ;;  %v152_v23 = vld [vmem:[%s533_s3 + $0x50] sm:$0xff]  ;;  %v153_v24 = vld [vmem:[%s533_s3 + $0x58] sm:$0xff]  ;;  %v154_v26 = vld [vmem:[%s533_s3 + $0x60] sm:$0xff] }
   0x9   :  { %341 = vmatpush3.bf16.msra.mxu0 %v338_v6  ;;  %v362_v25 = vpack.c.bf16 %v153_v24, %v152_v23  ;;  %v155_v27 = vld [vmem:[%s533_s3 + $0x68] sm:$0xff]  ;;  %v156_v29 = vld [vmem:[%s533_s3 + $0x70] sm:$0xff]  ;;  %v157_v30 = vld [vmem:[%s533_s3 + $0x78] sm:$0xff] }
   0xa   :  { %v366_v28 = vpack.c.bf16 %v155_v27, %v154_v26  ;;  %v370_v31 = vpack.c.bf16 %v157_v30, %v156_v29  ;;  %v260_v32 = vld [vmem:[%s534_s4] ss:$0 sm:$0xff] }
   0xb   :  { %349 = vmatpush3.bf16.msra.mxu1 %v346_v12  ;;  %34 = vst.msk [vmem:[#allocation2 + $0x8] sm:$0xff] %vm32_vm0, %v260_v32  ;;  %33 = vst.msk [vmem:[#allocation2] sm:$0xff] %vm32_vm0, %v260_v32  ;;  %v261_v33 = vld [vmem:[%s532_s2] ss:$0 sm:$0xff]  ;;  %s405_s2 = smov [#allocation3]  }
   0xc   :  { %297 = vmatmul.mubr.msk.f32.vlgmr.msra.gmra.mrb[0].mxu0 %vm32_vm0, %v36_v16  ;;  %351 = vmatprep.subr.bf16.mxu1 %v350_v15  ;;  %s249_s3 = sshll.u32 %s405_s2, 4  ;;  %s250_s3 = int_to_ptr.vmem [resolvable:$true] %s249_s3 }
   0xd   :  { %s381_s4 = scalar_lea.vmem %s250_s3, 256  ;;  %p386_p1 = scmp.lt.s32.totalorder %s250_s3, %s250_s3 }
   0xe   :  { %p382_p0 = scmp.ne.s32.totalorder %s250_s3, %s381_s4  ;;  %p387_p2 = scmp.lt.s32.totalorder %s381_s4, %s381_s4 }
   0xf   :  { %353 = vmatpush3.bf16.msra.mxu1 %v350_v15 }
  0x10   :  { %355 = vmatprep.subr.bf16.mxu1 %v354_v19  ;;  %p388_p3 = por %p387_p2, %p386_p1 }
  0x12   :  { %v141_v48 = vld [vmem:[#allocation2 + $0x8] sm:$0xff]  ;;  %v140_v49 = vld [vmem:[#allocation2] sm:$0xff]  ;;  %p389_p4 = pnand %p388_p3, %p382_p0 }
  0x13   :  { %357 = vmatpush3.bf16.msra.mxu1 %v354_v19 }
  0x14   :  { %359 = vmatprep.subr.bf16.mxu1 %v358_v22 }
  0x17   :  { %361 = vmatpush3.bf16.msra.mxu1 %v358_v22 }
  0x18   :  { %363 = vmatprep.subr.bf16.mxu1 %v362_v25 }
  0x1b   :  { %365 = vmatpush3.bf16.msra.mxu1 %v362_v25 }
  0x1c   :  { %367 = vmatprep.subr.bf16.mxu1 %v366_v28 }
  0x1f   :  { %369 = vmatpush3.bf16.msra.mxu1 %v366_v28 }
  0x20   :  { %371 = vmatprep.subr.bf16.mxu1 %v370_v31 }
  0x23   :  { %373 = vmatpush3.bf16.msra.mxu1 %v370_v31 }
  0xdf   :  { %v298_v34 = vpop.f32.mrb[0].mxu0 }
  0xe0   :  { %v127_v35 = vadd.f32 %v298_v34, %v261_v33  ;;  %v121_v36 = vpop.f32.mrb[1].mxu0 }
  0xe1   :  { %v122_v37 = vadd.f32 %v261_v33, %v121_v36 }
  0xe2   :  { %v133_v38 = vmul.f32 0.70710677, %v127_v35  ;;  %v131_v45 = vmul.f32 0.5, %v127_v35 }
  0xe3   :  { %v132_v39 = vmul.f32 0.70710677, %v122_v37  ;;  %v130_v43 = vmul.f32 0.5, %v122_v37 }
  0xe4   :  { %377 = verf.f32 %v133_v38 }
  0xe5   :  { %379 = verf.f32 %v132_v39 }
  0xee   :  { %v378_v40 = vpop.eup %377 }
  0xef   :  { %v380_v41 = vpop.eup %379  ;;  %v137_v42 = vadd.f32 1.0, %v378_v40 }
  0xf0   :  { %v136_v44 = vadd.f32 1.0, %v380_v41 }
  0xf1   :  { %v139_v47 = vmul.f32 %v137_v42, %v131_v45 }
  0xf2   :  { %v138_v46 = vmul.f32 %v136_v44, %v130_v43 }
  0xf4   :  { %331 = vmatprep.mubr.f32.mxu1 %v138_v46 }
  0xf5   :  { %332 = vmatmul.mubr.f32.vlgmr.msra.gmra.mrb[0].mxu1 %v139_v47 }
 0x1c8   :  { %v333_v50 = vpop.f32.mrb[0].mxu1 }
 0x1c9   :  { %v234_v51 = vadd.f32 %v333_v50, %v141_v48  ;;  %v224_v52 = vpop.f32.mrb[1].mxu1 }
 0x1ca   :  { %v233_v53 = vadd.f32 %v224_v52, %v140_v49 }
 0x1cb   :  { %236 = vst.msk [vmem:[#allocation2 + $0x8] sm:$0xff] %vm32_vm0, %v234_v51 }
 0x1cc   :  { %235 = vst.msk [vmem:[#allocation2] sm:$0xff] %vm32_vm0, %v233_v53 }
 0x1d2   :  { %v241_v54 = vld [vmem:[#allocation2 + $0x8] sm:$0xff] }
 0x1d3   :  { %v240_v55 = vld [vmem:[#allocation2] sm:$0xff]  ;;  %243 = vst.msk [vmem:[#allocation3 + $0x8] sm:$0xff] %vm32_vm0, %v241_v54 }
 0x1d4   :  { %242 = vst.msk [vmem:[#allocation3] sm:$0xff] %vm32_vm0, %v240_v55 }
 0x1d5   :  { %392 = shalt.err (!%p389_p4)
}
 0x1d6   :  { %s393_s15 = scalar_lea.hbm %s535_s5, 256 }
 0x1d7   :  { %p394_p5 = scmp.ne.s32.totalorder %s535_s5, %s393_s15  ;;  %p397_p6 = scmp.lt.u32.totalorder %s393_s15, %s535_s5 }
 0x1d9   :  { %p399_p7 = pnand %p397_p6, %p394_p5 }
 0x1db   :  { %402 = shalt.err (!%p399_p7)
}
 0x1dc   :  { %s406_s20 = smov 128   ;;  %s407_s21 = smov 8  }
 0x1dd   :  { %255 = dma.vmem_to_hbm [thread:$0]  %s250_s3, 256, %s535_s5, [#allocation4], %s406_s20, %s406_s20, %s407_s21  }
 0x1de   :  { %403 = dma.done.wait [#allocation4], 256  }
 0x1df   :  { %404 = vsyncadd [#allocation4], 4294967040 }
 0x1e0   :  { %259 = vsyncpa [#allocation4], 1 }

</bundles_post_ra>
